<compile_context>
chip_gen: v6e
topology: v6e:2x2x1
jax: 0.10.0
libtpu: 0.0.40
codegen_flags: <defaults>
</compile_context>

<pallas_src>
import functools

import jax
import jax.numpy as jnp
from jax.experimental import pallas as pl
from jax.experimental.pallas import tpu as pltpu


def pre_gnn_kernel(adj_ref, x_ref, w1_ref, b1_ref, w2_ref, b2_ref, o_ref, *,
                   K: int, negative_slope: float = 0.01):
    """Fused pre_GNN forward: normalization + ChebConv1 + LeakyReLU + ChebConv2.

    adj_ref: (N, N)     dense adjacency (symmetric, no self loops)
    x_ref  : (N, H)     node features
    w1_ref : (K*H, H)   layer-1 Chebyshev weights, stacked along rows
    b1_ref : (1, H)     layer-1 bias
    w2_ref : (K*H, H)   layer-2 Chebyshev weights, stacked along rows
    b2_ref : (1, H)     layer-2 bias
    o_ref  : (N, H)     output
    """
    adj = adj_ref[...]

    # --- scaled Laplacian (PyG ChebConv defaults: sym norm, lambda_max = 2) ---
    # L_tilde = 2L/lambda_max - I with L = I - D^{-1/2} A D^{-1/2}
    #         = -D^{-1/2} A D^{-1/2}
    # Row/col degree sums are identical for a symmetric adjacency; computing the
    # column-side sum directly avoids an in-kernel transpose.
    deg_row = jnp.sum(adj, axis=1, keepdims=True)              # (N, 1)  XLU reduce
    deg_col = jnp.sum(adj, axis=0, keepdims=True)              # (1, N)  XLU reduce
    dr = jnp.where(deg_row > 0, jax.lax.rsqrt(deg_row), 0.0)   # EUP
    dc = jnp.where(deg_col > 0, jax.lax.rsqrt(deg_col), 0.0)   # EUP
    lt = -(dr * adj * dc)                                      # (N, N)
    lt2 = 2.0 * lt                                             # hoisted out of loop

    def cheb_basis(x):
        """[T0 | T1 | ... | T_{K-1}] lane-concatenated -> (N, K*H)."""
        if K == 1:
            return x
        t_prev = x
        t_cur = jnp.dot(lt, x, preferred_element_type=jnp.float32)
        ts = [t_prev, t_cur]
        for _ in range(2, K):
            t_next = jnp.dot(lt2, t_cur,
                             preferred_element_type=jnp.float32) - t_prev
            ts.append(t_next)
            t_prev, t_cur = t_cur, t_next
        return jnp.concatenate(ts, axis=-1)

    # --- layer 1: ChebConv + LeakyReLU ---
    tcat1 = cheb_basis(x_ref[...])                                  # (N, K*H)
    h1 = jnp.dot(tcat1, w1_ref[...],
                 preferred_element_type=jnp.float32) + b1_ref[...]  # (N, H)
    h1 = jnp.maximum(h1, negative_slope * h1)                       # leaky_relu

    # TODO(synk): training-mode dropout (p=0.2) not implemented; inference only
    # (identity), matching nn.Dropout in eval mode.

    # --- layer 2: ChebConv ---
    tcat2 = cheb_basis(h1)                                          # (N, K*H)
    y = jnp.dot(tcat2, w2_ref[...],
                preferred_element_type=jnp.float32) + b2_ref[...]   # (N, H)

    o_ref[...] = y.astype(o_ref.dtype)


def pre_gnn_forward(x, adj, params):
    """pre_GNN.forward as one fused pallas_call (inference; dropout = identity)."""
    n, h = x.shape
    k = params["w1"].shape[0]

    # Stack the (K, H, H) weights into a (K*H, H) matrix so the K projections
    # become one lane-dense (N, K*H) x (K*H, H) MXU matmul inside the kernel.
    w1 = params["w1"].reshape(k * h, h)
    w2 = params["w2"].reshape(k * h, h)

    # Advisory cost hint for XLA's scheduler around this tiny custom call.
    node_mm_flops = 2 * (k - 1) * n * n * h            # lt @ T_k matmuls, per layer
    proj_flops = 2 * n * (k * h) * h                   # Tcat @ Wstack, per layer
    cost = pl.CostEstimate(
        flops=2 * (node_mm_flops + proj_flops),
        transcendentals=2 * n,                          # rsqrt of degrees
        bytes_accessed=4 * (n * n + 2 * n * h + 2 * k * h * h + 2 * h),
    )

    kern = functools.partial(pre_gnn_kernel, K=k, negative_slope=0.01)

    # NOTE(v7x): with a single graph there is no parallel axis to shard across
    # the two TensorCores; if a batch of graphs were processed, a leading
    # 'parallel' grid axis (and a lane-dense batched output layout) would be
    # the next win.
    return pl.pallas_call(
        kern,
        out_shape=jax.ShapeDtypeStruct((n, h), x.dtype),
        grid=(1,),
        in_specs=[
            pl.BlockSpec((n, n), lambda i: (0, 0)),       # adj
            pl.BlockSpec((n, h), lambda i: (0, 0)),       # x
            pl.BlockSpec((k * h, h), lambda i: (0, 0)),   # w1 stacked
            pl.BlockSpec((1, h), lambda i: (0, 0)),       # b1
            pl.BlockSpec((k * h, h), lambda i: (0, 0)),   # w2 stacked
            pl.BlockSpec((1, h), lambda i: (0, 0)),       # b2
        ],
        out_specs=pl.BlockSpec((n, h), lambda i: (0, 0)),
        compiler_params=pltpu.CompilerParams(
            dimension_semantics=("arbitrary",)),
        cost_estimate=cost,
    )(adj, x, w1, params["b1"], w2, params["b2"])


# ----------------------------- pure-JAX reference -----------------------------

def scaled_laplacian(adj):
    deg = jnp.sum(adj, axis=1)
    d_inv_sqrt = jnp.where(deg > 0, jax.lax.rsqrt(deg), 0.0)
    return -(d_inv_sqrt[:, None] * adj * d_inv_sqrt[None, :])


def _cheb_reference(l_tilde, x, w, b):
    K = w.shape[0]
    t_prev = x
    out = t_prev @ w[0]
    if K > 1:
        t_cur = l_tilde @ x
        out = out + t_cur @ w[1]
        for k in range(2, K):
            t_next = 2.0 * (l_tilde @ t_cur) - t_prev
            out = out + t_next @ w[k]
            t_prev, t_cur = t_cur, t_next
    return out + b


def _reference_forward(x, adj, params):
    lt = scaled_laplacian(adj)
    x1 = _cheb_reference(lt, x, params["w1"], params["b1"])
    x1 = jnp.where(x1 >= 0, x1, 0.01 * x1)  # leaky_relu
    return _cheb_reference(lt, x1, params["w2"], params["b2"])


if __name__ == "__main__":
    N = 16        # number of nodes
    HIDDEN1 = 32  # hidden1 (ChebConv in = out = hidden1)
    K = 4         # Kvalue

    key = jax.random.PRNGKey(0)
    k_x, k_a, k_w1, k_b1, k_w2, k_b2 = jax.random.split(key, 6)

    # Node features [N, hidden1]
    x = jax.random.normal(k_x, (N, HIDDEN1), dtype=jnp.float32)

    # Symmetric 0/1 adjacency (no self-loops), dense [N, N]
    a = (jax.random.uniform(k_a, (N, N)) < 0.3).astype(jnp.float32)
    adj = jnp.maximum(a, a.T) * (1.0 - jnp.eye(N, dtype=jnp.float32))

    # Deterministic ChebConv parameters: W[k] ~ glorot-ish scale, small biases.
    scale = 1.0 / jnp.sqrt(jnp.float32(HIDDEN1))
    params = {
        "w1": jax.random.normal(k_w1, (K, HIDDEN1, HIDDEN1), jnp.float32) * scale,
        "b1": jax.random.normal(k_b1, (1, HIDDEN1), jnp.float32) * 0.01,
        "w2": jax.random.normal(k_w2, (K, HIDDEN1, HIDDEN1), jnp.float32) * scale,
        "b2": jax.random.normal(k_b2, (1, HIDDEN1), jnp.float32) * 0.01,
    }

    out = jax.block_until_ready(pre_gnn_forward(x, adj, params))
    ref = jax.block_until_ready(_reference_forward(x, adj, params))

    assert out.shape == (N, HIDDEN1)
    assert jnp.allclose(out, ref, rtol=2e-2, atol=2e-2), "kernel/reference mismatch"
    print("KERNEL_OK")
</pallas_src>

<mosaic_0001>
module attributes {stable_mosaic.version = 11 : i64} {
  func.func @pre_gnn_kernel(%arg0: i32, %arg1: memref<16x16xf32, #tpu.memory_space<vmem>>, %arg2: memref<16x32xf32, #tpu.memory_space<vmem>>, %arg3: memref<128x32xf32, #tpu.memory_space<vmem>>, %arg4: memref<1x32xf32, #tpu.memory_space<vmem>>, %arg5: memref<128x32xf32, #tpu.memory_space<vmem>>, %arg6: memref<1x32xf32, #tpu.memory_space<vmem>>, %arg7: memref<16x32xf32, #tpu.memory_space<vmem>>) attributes {dimension_semantics = [#tpu.dimension_semantics<arbitrary>], iteration_bounds = array<i64: 1>, scalar_prefetch = 0 : i64, scratch_operands = 0 : i64, tpu.core_type = #tpu.core_type<tc>, window_params = [{pipeline_mode = #tpu.pipeline_mode<synchronous>, transform_indices = @transform_0, window_bounds = array<i64: 16, 16>}, {pipeline_mode = #tpu.pipeline_mode<synchronous>, transform_indices = @transform_1, window_bounds = array<i64: 16, 32>}, {pipeline_mode = #tpu.pipeline_mode<synchronous>, transform_indices = @transform_2, window_bounds = array<i64: 128, 32>}, {pipeline_mode = #tpu.pipeline_mode<synchronous>, transform_indices = @transform_3, window_bounds = array<i64: 1, 32>}, {pipeline_mode = #tpu.pipeline_mode<synchronous>, transform_indices = @transform_4, window_bounds = array<i64: 128, 32>}, {pipeline_mode = #tpu.pipeline_mode<synchronous>, transform_indices = @transform_5, window_bounds = array<i64: 1, 32>}, {pipeline_mode = #tpu.pipeline_mode<synchronous>, transform_indices = @transform_6, window_bounds = array<i64: 16, 32>}]} {
    %c0 = arith.constant 0 : index
    %c0_0 = arith.constant 0 : index
    %0 = vector.load %arg1[%c0, %c0_0] : memref<16x16xf32, #tpu.memory_space<vmem>>, vector<16x16xf32>
    %cst = arith.constant dense<0.000000e+00> : vector<16xf32>
    %1 = vector.multi_reduction <add>, %0, %cst [1] : vector<16x16xf32> to vector<16xf32>
    %2 = vector.shape_cast %1 : vector<16xf32> to vector<16x1xf32>
    %cst_1 = arith.constant dense<0.000000e+00> : vector<16xf32>
    %3 = vector.multi_reduction <add>, %0, %cst_1 [0] : vector<16x16xf32> to vector<16xf32>
    %4 = vector.shape_cast %3 : vector<16xf32> to vector<1x16xf32>
    %cst_2 = arith.constant 0.000000e+00 : f32
    %5 = vector.broadcast %cst_2 : f32 to vector<16x1xf32>
    %6 = arith.cmpf ogt, %2, %5 : vector<16x1xf32>
    %7 = math.rsqrt %2 : vector<16x1xf32>
    %cst_3 = arith.constant 0.000000e+00 : f32
    %8 = vector.broadcast %cst_3 : f32 to vector<16x1xf32>
    %9 = arith.select %6, %7, %8 : vector<16x1xi1>, vector<16x1xf32>
    %cst_4 = arith.constant 0.000000e+00 : f32
    %10 = vector.broadcast %cst_4 : f32 to vector<1x16xf32>
    %11 = arith.cmpf ogt, %4, %10 : vector<1x16xf32>
    %12 = math.rsqrt %4 : vector<1x16xf32>
    %cst_5 = arith.constant 0.000000e+00 : f32
    %13 = vector.broadcast %cst_5 : f32 to vector<1x16xf32>
    %14 = arith.select %11, %12, %13 : vector<1x16xi1>, vector<1x16xf32>
    %15 = vector.broadcast %9 : vector<16x1xf32> to vector<16x16xf32>
    %16 = arith.mulf %15, %0 : vector<16x16xf32>
    %17 = vector.broadcast %14 : vector<1x16xf32> to vector<16x16xf32>
    %18 = arith.mulf %16, %17 : vector<16x16xf32>
    %cst_6 = arith.constant 0.000000e+00 : f32
    %19 = vector.broadcast %cst_6 : f32 to vector<16x16xf32>
    %20 = arith.subf %19, %18 : vector<16x16xf32>
    %cst_7 = arith.constant 2.000000e+00 : f32
    %21 = vector.broadcast %cst_7 : f32 to vector<16x16xf32>
    %22 = arith.mulf %21, %20 : vector<16x16xf32>
    %c0_8 = arith.constant 0 : index
    %c0_9 = arith.constant 0 : index
    %23 = vector.load %arg2[%c0_8, %c0_9] : memref<16x32xf32, #tpu.memory_space<vmem>>, vector<16x32xf32>
    %cst_10 = arith.constant dense<0.000000e+00> : vector<16x32xf32>
    %24 = tpu.matmul %20, %23, %cst_10 {dimension_numbers = #tpu.dot_dimension_numbers<[1], [0], [0], [1], [0, 0, 1, 1], [], []>} : vector<16x16xf32>, vector<16x32xf32>, vector<16x32xf32> -> vector<16x32xf32>
    %cst_11 = arith.constant dense<0.000000e+00> : vector<16x32xf32>
    %25 = tpu.matmul %22, %24, %cst_11 {dimension_numbers = #tpu.dot_dimension_numbers<[1], [0], [0], [1], [0, 0, 1, 1], [], []>} : vector<16x16xf32>, vector<16x32xf32>, vector<16x32xf32> -> vector<16x32xf32>
    %26 = arith.subf %25, %23 : vector<16x32xf32>
    %cst_12 = arith.constant dense<0.000000e+00> : vector<16x32xf32>
    %27 = tpu.matmul %22, %26, %cst_12 {dimension_numbers = #tpu.dot_dimension_numbers<[1], [0], [0], [1], [0, 0, 1, 1], [], []>} : vector<16x16xf32>, vector<16x32xf32>, vector<16x32xf32> -> vector<16x32xf32>
    %28 = arith.subf %27, %24 : vector<16x32xf32>
    %29 = tpu.concatenate %23, %24, %26, %28 in 1 : vector<16x32xf32>, vector<16x32xf32>, vector<16x32xf32>, vector<16x32xf32> -> vector<16x128xf32>
    %c0_13 = arith.constant 0 : index
    %c0_14 = arith.constant 0 : index
    %30 = vector.load %arg3[%c0_13, %c0_14] : memref<128x32xf32, #tpu.memory_space<vmem>>, vector<128x32xf32>
    %cst_15 = arith.constant dense<0.000000e+00> : vector<16x32xf32>
    %31 = tpu.matmul %29, %30, %cst_15 {dimension_numbers = #tpu.dot_dimension_numbers<[1], [0], [0], [1], [0, 0, 1, 1], [], []>} : vector<16x128xf32>, vector<128x32xf32>, vector<16x32xf32> -> vector<16x32xf32>
    %c0_16 = arith.constant 0 : index
    %c0_17 = arith.constant 0 : index
    %32 = vector.load %arg4[%c0_16, %c0_17] : memref<1x32xf32, #tpu.memory_space<vmem>>, vector<1x32xf32>
    %33 = vector.broadcast %32 : vector<1x32xf32> to vector<16x32xf32>
    %34 = arith.addf %31, %33 : vector<16x32xf32>
    %cst_18 = arith.constant 0.00999999977 : f32
    %35 = vector.broadcast %cst_18 : f32 to vector<16x32xf32>
    %36 = arith.mulf %35, %34 : vector<16x32xf32>
    %37 = arith.maximumf %34, %36 : vector<16x32xf32>
    %cst_19 = arith.constant dense<0.000000e+00> : vector<16x32xf32>
    %38 = tpu.matmul %20, %37, %cst_19 {dimension_numbers = #tpu.dot_dimension_numbers<[1], [0], [0], [1], [0, 0, 1, 1], [], []>} : vector<16x16xf32>, vector<16x32xf32>, vector<16x32xf32> -> vector<16x32xf32>
    %cst_20 = arith.constant dense<0.000000e+00> : vector<16x32xf32>
    %39 = tpu.matmul %22, %38, %cst_20 {dimension_numbers = #tpu.dot_dimension_numbers<[1], [0], [0], [1], [0, 0, 1, 1], [], []>} : vector<16x16xf32>, vector<16x32xf32>, vector<16x32xf32> -> vector<16x32xf32>
    %40 = arith.subf %39, %37 : vector<16x32xf32>
    %cst_21 = arith.constant dense<0.000000e+00> : vector<16x32xf32>
    %41 = tpu.matmul %22, %40, %cst_21 {dimension_numbers = #tpu.dot_dimension_numbers<[1], [0], [0], [1], [0, 0, 1, 1], [], []>} : vector<16x16xf32>, vector<16x32xf32>, vector<16x32xf32> -> vector<16x32xf32>
    %42 = arith.subf %41, %38 : vector<16x32xf32>
    %43 = tpu.concatenate %37, %38, %40, %42 in 1 : vector<16x32xf32>, vector<16x32xf32>, vector<16x32xf32>, vector<16x32xf32> -> vector<16x128xf32>
    %c0_22 = arith.constant 0 : index
    %c0_23 = arith.constant 0 : index
    %44 = vector.load %arg5[%c0_22, %c0_23] : memref<128x32xf32, #tpu.memory_space<vmem>>, vector<128x32xf32>
    %cst_24 = arith.constant dense<0.000000e+00> : vector<16x32xf32>
    %45 = tpu.matmul %43, %44, %cst_24 {dimension_numbers = #tpu.dot_dimension_numbers<[1], [0], [0], [1], [0, 0, 1, 1], [], []>} : vector<16x128xf32>, vector<128x32xf32>, vector<16x32xf32> -> vector<16x32xf32>
    %c0_25 = arith.constant 0 : index
    %c0_26 = arith.constant 0 : index
    %46 = vector.load %arg6[%c0_25, %c0_26] : memref<1x32xf32, #tpu.memory_space<vmem>>, vector<1x32xf32>
    %47 = vector.broadcast %46 : vector<1x32xf32> to vector<16x32xf32>
    %48 = arith.addf %45, %47 : vector<16x32xf32>
    %c0_27 = arith.constant 0 : index
    %c0_28 = arith.constant 0 : index
    %49 = vector.load %arg7[%c0_27, %c0_28] : memref<16x32xf32, #tpu.memory_space<vmem>>, vector<16x32xf32>
    tpu.vector_store %arg7[%c0_27, %c0_28], %48 {strides = array<i32>} : memref<16x32xf32, #tpu.memory_space<vmem>>, vector<16x32xf32>,
    return
  }
  func.func @transform_0(%arg0: i32) -> (i32, i32) {
    %c0_i32 = arith.constant 0 : i32
    %c0_i32_0 = arith.constant 0 : i32
    %c0_i32_1 = arith.constant 0 : i32
    return %c0_i32, %c0_i32_0 : i32, i32
  }
  func.func @transform_1(%arg0: i32) -> (i32, i32) {
    %c0_i32 = arith.constant 0 : i32
    %c0_i32_0 = arith.constant 0 : i32
    %c0_i32_1 = arith.constant 0 : i32
    return %c0_i32, %c0_i32_0 : i32, i32
  }
  func.func @transform_2(%arg0: i32) -> (i32, i32) {
    %c0_i32 = arith.constant 0 : i32
    %c0_i32_0 = arith.constant 0 : i32
    %c0_i32_1 = arith.constant 0 : i32
    return %c0_i32, %c0_i32_0 : i32, i32
  }
  func.func @transform_3(%arg0: i32) -> (i32, i32) {
    %c0_i32 = arith.constant 0 : i32
    %c0_i32_0 = arith.constant 0 : i32
    %c0_i32_1 = arith.constant 0 : i32
    return %c0_i32, %c0_i32_0 : i32, i32
  }
  func.func @transform_4(%arg0: i32) -> (i32, i32) {
    %c0_i32 = arith.constant 0 : i32
    %c0_i32_0 = arith.constant 0 : i32
    %c0_i32_1 = arith.constant 0 : i32
    return %c0_i32, %c0_i32_0 : i32, i32
  }
  func.func @transform_5(%arg0: i32) -> (i32, i32) {
    %c0_i32 = arith.constant 0 : i32
    %c0_i32_0 = arith.constant 0 : i32
    %c0_i32_1 = arith.constant 0 : i32
    return %c0_i32, %c0_i32_0 : i32, i32
  }
  func.func @transform_6(%arg0: i32) -> (i32, i32) {
    %c0_i32 = arith.constant 0 : i32
    %c0_i32_0 = arith.constant 0 : i32
    %c0_i32_1 = arith.constant 0 : i32
    return %c0_i32, %c0_i32_0 : i32, i32
  }
}

</mosaic_0001>

<bundles_post_ra>
// kernel: tpu_custom_call.1
= control target key start
LH: loop header
LB: loop body
LE: loop exit
PB: predicated region body
PF: predicated region fallthrough
CT: control target
= control target key end

     0   :  { %vm26_vm0 = vcmask 130048   ;;  %s1317_s0 = inlined_call_operand.vmem [shape: f32[16,16], index: 0, kind: input, shape index: {}]   ;;  %s1318_s1 = inlined_call_operand.vmem [shape: f32[16,32], index: 1, kind: input, shape index: {}]   ;;  %s1319_s2 = inlined_call_operand.vmem [shape: f32[128,32], index: 2, kind: input, shape index: {}]   ;;  %s1320_s3 = inlined_call_operand.vmem [shape: f32[1,32], index: 3, kind: input, shape index: {}]   ;;  %s1321_s4 = inlined_call_operand.vmem [shape: f32[128,32], index: 4, kind: input, shape index: {}]   ;;  %s1322_s5 = inlined_call_operand.vmem [shape: f32[1,32], index: 5, kind: input, shape index: {}]   ;;  %s1323_s6 = inlined_call_operand.hbm [shape: f32[16,32], index: 6, kind: output, shape index: {}]  }
   0x1   :  { %v24_v0 = vld [vmem:[%s1317_s0] sm:$0xff]  ;;  %v25_v1 = vld [vmem:[%s1317_s0 + $0x8] sm:$0xff] }
   0x2   :  { %11 = vsyncpa [#allocation3], 0  ;;  %v27_v2 = vsel %vm26_vm0, %v24_v0, 0.0  ;;  %v30_v3 = vsel %vm26_vm0, %v25_v1, 0.0  ;;  %v1112_v5 = vld [vmem:[%s1318_s1 + $0x8] sm:$0xff]  ;;  %v1119_v6 = vld [vmem:[%s1318_s1] sm:$0xff] }
   0x3   :  { %28 = vadd.xlane.f32.xlu0 %v27_v2  ;;  %v33_v4 = vadd.f32 %v30_v3, %v27_v2  ;;  %884 = vmatprep.subr.mxu1 %v1112_v5  ;;  %s1060_s0 = smov 32   ;;  %s1061_s1 = smov 64   ;;  %v348_v37 = vld [vmem:[%s1319_s2 + $0x78] sm:$0xff]  ;;  %v347_v38 = vld [vmem:[%s1319_s2 + $0x70] sm:$0xff]  ;;  %v346_v39 = vld [vmem:[%s1319_s2 + $0x68] sm:$0xff]  ;;  %vm324_vm4 = vcmask 261120  }
   0x4   :  { %885 = vmatpush3.msra.mxu1 %v1112_v5  ;;  %v345_v40 = vld [vmem:[%s1319_s2 + $0x60] sm:$0xff]  ;;  %v344_v41 = vld [vmem:[%s1319_s2 + $0x58] sm:$0xff]  ;;  %v343_v42 = vld [vmem:[%s1319_s2 + $0x50] sm:$0xff]  ;;  %s1062_s13 = smov 96   ;;  %vm327_vm5 = vcmask 523264   ;;  %vm330_vm6 = vcmask 785408  }
   0x5   :  { %886 = vmatprep.subr.mxu1 %v1119_v6  ;;  %v34_v7 = vrot.slane %v33_v4, 4  ;;  %v342_v43 = vld [vmem:[%s1319_s2 + $0x48] sm:$0xff]  ;;  %v341_v44 = vld [vmem:[%s1319_s2 + $0x40] sm:$0xff]  ;;  %v340_v45 = vld [vmem:[%s1319_s2 + $0x38] sm:$0xff]  ;;  %s1063_s18 = smov [#allocation2]  }
   0x6   :  { %887 = vmatpush3.msra.mxu1 %v1119_v6  ;;  %v339_v46 = vld [vmem:[%s1319_s2 + $0x30] sm:$0xff]  ;;  %v338_v47 = vld [vmem:[%s1319_s2 + $0x28] sm:$0xff]  ;;  %v337_v48 = vld [vmem:[%s1319_s2 + $0x20] sm:$0xff] }
   0x7   :  { %31 = vadd.xlane.f32.xlu0 %v30_v3  ;;  %v35_v8 = vadd.f32 %v34_v7, %v33_v4  ;;  %v336_v49 = vld [vmem:[%s1319_s2 + $0x18] sm:$0xff]  ;;  %v335_v50 = vld [vmem:[%s1319_s2 + $0x10] sm:$0xff]  ;;  %v334_v51 = vld [vmem:[%s1319_s2 + $0x8] sm:$0xff] }
   0x8   :  { %v333_v52 = vld [vmem:[%s1319_s2] sm:$0xff] }
   0x9   :  { %v36_v9 = vrot.slane %v35_v8, 2 }
   0xb   :  { %v37_v10 = vadd.f32 %v36_v9, %v35_v8 }
   0xd   :  { %v38_v11 = vrot.slane %v37_v10, 1 }
   0xf   :  { %v39_v12 = vadd.f32 %v38_v11, %v37_v10  ;;  %v816_v11 = vld [vmem:[%s1320_s3] ss:$0 sm:$0xff] }
  0x11   :  { %1032 = vrsqrt.f32 %v39_v12  ;;  %vm46_vm1 = vcmp.gt.f32.partialorder %v39_v12, 0.0 }
  0x1e   :  { %v1033_v15 = vpop.eup %1032 }
  0x1f   :  { %v48_v18 = vsel %vm46_vm1, %v1033_v15, 0.0 }
  0x8c   :  { %v29_v13 = vpop.xlane.xlu0 %28 }
  0x8d   :  { %1034 = vrsqrt.f32 %v29_v13  ;;  %vm40_vm2 = vcmp.gt.f32.partialorder %v29_v13, 0.0 }
  0x90   :  { %v32_v14 = vpop.xlane.xlu0 %31 }
  0x91   :  { %1036 = vrsqrt.f32 %v32_v14  ;;  %vm41_vm3 = vcmp.gt.f32.partialorder %v32_v14, 0.0 }
  0x9a   :  { %v1035_v16 = vpop.eup %1034 }
  0x9b   :  { %v44_v17 = vsel %vm40_vm2, %v1035_v16, 0.0 }
  0x9c   :  { %v49_v19 = vmul.f32 %v44_v17, %v24_v0 }
  0x9e   :  { %v1037_v20 = vpop.eup %1036  ;;  %v51_v21 = vmul.f32 %v49_v19, %v48_v18 }
  0x9f   :  { %v45_v22 = vsel %vm41_vm3, %v1037_v20, 0.0 }
  0xa0   :  { %v50_v23 = vmul.f32 %v45_v22, %v25_v1  ;;  %v53_v24 = vsub.f32 0.0, %v51_v21 }
  0xa2   :  { %v52_v25 = vmul.f32 %v50_v23, %v48_v18  ;;  %888 = vmatprep.mubr.msk.f32.mxu1 %vm26_vm0, %v53_v24  ;;  %944 = vmatprep.mubr.msk.f32.mxu0 %vm26_vm0, %v53_v24  ;;  %v1127_v27 = vmul.f32 2.0, %v53_v24 }
  0xa4   :  { %v1125_v26 = vsub.f32 0.0, %v52_v25 }
  0xa6   :  { %889 = vmatmul.mubr.msk.f32.vlgmr.msra.gmra.mxu1 %vm26_vm0, %v1125_v26  ;;  %v1140_v30 = vmul.f32 2.0, %v1125_v26 }
  0xa7   :  { %895 = vmatprep.mubr.msk.f32.mxu1 %vm26_vm0, %v1127_v27 }
 0x166   :  { %v1133_v28 = vpop.f32.mrf.mxu1 }
 0x167   :  { %891 = vmatprep.subr.mxu1 %v1133_v28 }
 0x168   :  { %v1136_v29 = vpop.f32.mrf.mxu1  ;;  %892 = vmatpush3.msra.mxu1 %v1133_v28 }
 0x169   :  { %893 = vmatprep.subr.mxu1 %v1136_v29  ;;  %v1002_v31 = vpack.i.bf16 %v1133_v28, %v1136_v29 }
 0x16a   :  { %894 = vmatpush3.msra.mxu1 %v1136_v29 }
 0x16b   :  { %1003 = vrot.lane.b32.xlu1 %v1002_v31, %s1060_s0  ;;  %896 = vmatmul.mubr.msk.f32.vlgmr.msra.gmra.mxu1 %vm26_vm0, %v1140_v30  ;;  %v704_v31 = vld [vmem:[%s1321_s4 + $0x50] sm:$0xff] }
 0x16c   :  { %902 = vmatprep.mubr.msk.f32.mxu1 %vm26_vm0, %v1127_v27 }
 0x1dd   :  { %v1004_v58 = vpop.permute.xlu1 %1003 }
 0x1de   :  { %v1006_v60 = vunpack.i.h.bf16 %v1004_v58  ;;  %v1005_v61 = vunpack.i.l.bf16 %v1004_v58 }
 0x1e0   :  { %v326_v1 = vsel %vm324_vm4, %v1112_v5, %v1006_v60  ;;  %v325_v4 = vsel %vm324_vm4, %v1119_v6, %v1005_v61 }
 0x22b   :  { %v897_v32 = vpop.f32.mrf.mxu1 }
 0x22c   :  { %v222_v33 = vsub.f32 %v897_v32, %v1112_v5  ;;  %v703_v32 = vld [vmem:[%s1321_s4 + $0x48] sm:$0xff] }
 0x22d   :  { %v212_v34 = vpop.f32.mrf.mxu1 }
 0x22e   :  { %v221_v35 = vsub.f32 %v212_v34, %v1119_v6  ;;  %898 = vmatprep.subr.mxu1 %v222_v33  ;;  %v701_v34 = vld [vmem:[%s1321_s4 + $0x38] sm:$0xff] }
 0x22f   :  { %899 = vmatpush3.msra.mxu1 %v222_v33 }
 0x230   :  { %900 = vmatprep.subr.mxu1 %v221_v35  ;;  %v1007_v36 = vpack.i.bf16 %v222_v33, %v221_v35  ;;  %v702_v33 = vld [vmem:[%s1321_s4 + $0x40] sm:$0xff] }
 0x231   :  { %901 = vmatpush3.msra.mxu1 %v221_v35  ;;  %v700_v35 = vld [vmem:[%s1321_s4 + $0x30] sm:$0xff] }
 0x232   :  { %1008 = vrot.lane.b32.xlu1 %v1007_v36, %s1061_s1  ;;  %903 = vmatmul.mubr.msk.f32.vlgmr.msra.gmra.mxu1 %vm26_vm0, %v1140_v30  ;;  %v699_v36 = vld [vmem:[%s1321_s4 + $0x28] sm:$0xff] }
 0x233   :  { %905 = vmatprep.subr.mxu1 %v348_v37 }
 0x234   :  { %906 = vmatpush3.msra.mxu1 %v348_v37  ;;  %v698_v37 = vld [vmem:[%s1321_s4 + $0x20] sm:$0xff] }
 0x235   :  { %907 = vmatprep.subr.mxu1 %v347_v38 }
 0x236   :  { %908 = vmatpush3.msra.mxu1 %v347_v38  ;;  %v697_v38 = vld [vmem:[%s1321_s4 + $0x18] sm:$0xff] }
 0x237   :  { %909 = vmatprep.subr.mxu1 %v346_v39 }
 0x238   :  { %910 = vmatpush3.msra.mxu1 %v346_v39  ;;  %v696_v39 = vld [vmem:[%s1321_s4 + $0x10] sm:$0xff] }
 0x239   :  { %911 = vmatprep.subr.mxu1 %v345_v40 }
 0x23a   :  { %912 = vmatpush3.msra.mxu1 %v345_v40  ;;  %v695_v40 = vld [vmem:[%s1321_s4 + $0x8] sm:$0xff] }
 0x23b   :  { %913 = vmatprep.subr.mxu1 %v344_v41 }
 0x23c   :  { %914 = vmatpush3.msra.mxu1 %v344_v41  ;;  %v694_v41 = vld [vmem:[%s1321_s4] sm:$0xff] }
 0x23d   :  { %915 = vmatprep.subr.mxu1 %v343_v42 }
 0x23e   :  { %916 = vmatpush3.msra.mxu1 %v343_v42 }
 0x23f   :  { %917 = vmatprep.subr.mxu1 %v342_v43 }
 0x240   :  { %918 = vmatpush3.msra.mxu1 %v342_v43 }
 0x241   :  { %919 = vmatprep.subr.mxu1 %v341_v44 }
 0x242   :  { %920 = vmatpush3.msra.mxu1 %v341_v44 }
 0x243   :  { %921 = vmatprep.subr.mxu1 %v340_v45 }
 0x244   :  { %922 = vmatpush3.msra.mxu1 %v340_v45 }
 0x245   :  { %923 = vmatprep.subr.mxu1 %v339_v46 }
 0x246   :  { %924 = vmatpush3.msra.mxu1 %v339_v46 }
 0x247   :  { %925 = vmatprep.subr.mxu1 %v338_v47 }
 0x248   :  { %926 = vmatpush3.msra.mxu1 %v338_v47 }
 0x249   :  { %927 = vmatprep.subr.mxu1 %v337_v48 }
 0x24a   :  { %928 = vmatpush3.msra.mxu1 %v337_v48 }
 0x24b   :  { %929 = vmatprep.subr.mxu1 %v336_v49 }
 0x24c   :  { %930 = vmatpush3.msra.mxu1 %v336_v49 }
 0x24d   :  { %931 = vmatprep.subr.mxu1 %v335_v50 }
 0x24e   :  { %932 = vmatpush3.msra.mxu1 %v335_v50 }
 0x24f   :  { %933 = vmatprep.subr.mxu1 %v334_v51 }
 0x250   :  { %934 = vmatpush3.msra.mxu1 %v334_v51 }
 0x251   :  { %935 = vmatprep.subr.mxu1 %v333_v52 }
 0x252   :  { %936 = vmatpush3.msra.mxu1 %v333_v52 }
 0x2a4   :  { %v1009_v59 = vpop.permute.xlu1 %1008 }
 0x2a5   :  { %v1011_v62 = vunpack.i.h.bf16 %v1009_v59  ;;  %v1010_v63 = vunpack.i.l.bf16 %v1009_v59 }
 0x2a7   :  { %v328_v7 = vsel %vm327_vm5, %v325_v4, %v1010_v63  ;;  %v329_v8 = vsel %vm327_vm5, %v326_v1, %v1011_v62  ;;  %v823_v62 = vld [vmem:[%s1322_s5] ss:$0 sm:$0xff] }
 0x2f2   :  { %v904_v53 = vpop.f32.mrf.mxu1 }
 0x2f3   :  { %v299_v55 = vsub.f32 %v904_v53, %v1133_v28  ;;  %v707_v28 = vld [vmem:[%s1321_s4 + $0x68] sm:$0xff] }
 0x2f4   :  { %v289_v54 = vpop.f32.mrf.mxu1 }
 0x2f5   :  { %v298_v56 = vsub.f32 %v289_v54, %v1136_v29  ;;  %v706_v29 = vld [vmem:[%s1321_s4 + $0x60] sm:$0xff] }
 0x2f7   :  { %v1012_v57 = vpack.i.bf16 %v299_v55, %v298_v56 }
 0x2f9   :  { %1013 = vrot.lane.b32.xlu0 %v1012_v57, %s1062_s13 }
 0x36b   :  { %v1014_v0 = vpop.permute.xlu0 %1013 }
 0x36c   :  { %v1016_v2 = vunpack.i.h.bf16 %v1014_v0  ;;  %v1015_v3 = vunpack.i.l.bf16 %v1014_v0 }
 0x36e   :  { %v331_v9 = vsel %vm330_vm6, %v328_v7, %v1015_v3  ;;  %v332_v10 = vsel %vm330_vm6, %v329_v8, %v1016_v2 }
 0x36f   :  { %937 = vmatprep.mubr.f32.mxu1 %v331_v9 }
 0x370   :  { %938 = vmatmul.mubr.f32.vlgmr.msra.gmra.mxu1 %v332_v10 }
 0x430   :  { %v939_v5 = vpop.f32.mrf.mxu1 }
 0x431   :  { %v428_v12 = vadd.f32 %v939_v5, %v816_v11 }
 0x432   :  { %v422_v13 = vpop.f32.mrf.mxu1 }
 0x433   :  { %v432_v14 = vmul.f32 0.01, %v428_v12  ;;  %v423_v15 = vadd.f32 %v816_v11, %v422_v13 }
 0x435   :  { %v1218_v6 = vmax.f32 %v428_v12, %v432_v14  ;;  %v431_v16 = vmul.f32 0.01, %v423_v15 }
 0x437   :  { %v1220_v17 = vmax.f32 %v423_v15, %v431_v16  ;;  %940 = vmatprep.subr.mxu0 %v1218_v6 }
 0x438   :  { %941 = vmatpush3.msra.mxu0 %v1218_v6 }
 0x439   :  { %942 = vmatprep.subr.mxu0 %v1220_v17 }
 0x43a   :  { %943 = vmatpush3.msra.mxu0 %v1220_v17 }
 0x43b   :  { %945 = vmatmul.mubr.msk.f32.vlgmr.msra.gmra.mxu0 %vm26_vm0, %v1125_v26  ;;  %v709_v26 = vld [vmem:[%s1321_s4 + $0x78] sm:$0xff] }
 0x43c   :  { %951 = vmatprep.mubr.msk.f32.mxu0 %vm26_vm0, %v1127_v27 }
 0x4fb   :  { %v1230_v18 = vpop.f32.mrf.mxu0 }
 0x4fc   :  { %947 = vmatprep.subr.mxu0 %v1230_v18 }
 0x4fd   :  { %v1233_v19 = vpop.f32.mrf.mxu0  ;;  %948 = vmatpush3.msra.mxu0 %v1230_v18 }
 0x4fe   :  { %949 = vmatprep.subr.mxu0 %v1233_v19  ;;  %v1017_v20 = vpack.i.bf16 %v1230_v18, %v1233_v19 }
 0x4ff   :  { %950 = vmatpush3.msra.mxu0 %v1233_v19 }
 0x500   :  { %1018 = vrot.lane.b32.xlu1 %v1017_v20, %s1060_s0  ;;  %952 = vmatmul.mubr.msk.f32.vlgmr.msra.gmra.mxu0 %vm26_vm0, %v1140_v30 }
 0x501   :  { %958 = vmatprep.mubr.msk.f32.mxu0 %vm26_vm0, %v1127_v27  ;;  %v708_v27 = vld [vmem:[%s1321_s4 + $0x70] sm:$0xff] }
 0x572   :  { %v1019_v47 = vpop.permute.xlu1 %1018 }
 0x573   :  { %v1021_v49 = vunpack.i.h.bf16 %v1019_v47  ;;  %v1020_v50 = vunpack.i.l.bf16 %v1019_v47 }
 0x575   :  { %v689_v54 = vsel %vm324_vm4, %v1218_v6, %v1021_v49  ;;  %v688_v57 = vsel %vm324_vm4, %v1220_v17, %v1020_v50 }
 0x5c0   :  { %v953_v21 = vpop.f32.mrf.mxu0 }
 0x5c1   :  { %v586_v22 = vsub.f32 %v953_v21, %v1218_v6 }
 0x5c2   :  { %v576_v23 = vpop.f32.mrf.mxu0 }
 0x5c3   :  { %v585_v24 = vsub.f32 %v576_v23, %v1220_v17  ;;  %954 = vmatprep.subr.mxu0 %v586_v22 }
 0x5c4   :  { %955 = vmatpush3.msra.mxu0 %v586_v22 }
 0x5c5   :  { %956 = vmatprep.subr.mxu0 %v585_v24  ;;  %v1022_v25 = vpack.i.bf16 %v586_v22, %v585_v24 }
 0x5c6   :  { %957 = vmatpush3.msra.mxu0 %v585_v24 }
 0x5c7   :  { %1023 = vrot.lane.b32.xlu1 %v1022_v25, %s1061_s1  ;;  %959 = vmatmul.mubr.msk.f32.vlgmr.msra.gmra.mxu0 %vm26_vm0, %v1140_v30  ;;  %v705_v30 = vld [vmem:[%s1321_s4 + $0x58] sm:$0xff]  ;;  %s799_s1 = sshll.u32 %s1063_s18, 4  ;;  %s800_s1 = int_to_ptr.vmem [resolvable:$true] %s799_s1 }
 0x5c8   :  { %961 = vmatprep.subr.mxu0 %v709_v26  ;;  %s1038_s19 = scalar_lea.vmem %s800_s1, 256  ;;  %p1043_p1 = scmp.lt.s32.totalorder %s800_s1, %s800_s1 }
 0x5c9   :  { %962 = vmatpush3.msra.mxu0 %v709_v26  ;;  %p1039_p0 = scmp.ne.s32.totalorder %s800_s1, %s1038_s19  ;;  %p1044_p2 = scmp.lt.s32.totalorder %s1038_s19, %s1038_s19 }
 0x5ca   :  { %963 = vmatprep.subr.mxu0 %v708_v27 }
 0x5cb   :  { %964 = vmatpush3.msra.mxu0 %v708_v27  ;;  %p1045_p3 = por %p1044_p2, %p1043_p1 }
 0x5cc   :  { %965 = vmatprep.subr.mxu0 %v707_v28 }
 0x5cd   :  { %966 = vmatpush3.msra.mxu0 %v707_v28  ;;  %p1046_p4 = pnand %p1045_p3, %p1039_p0 }
 0x5ce   :  { %967 = vmatprep.subr.mxu0 %v706_v29 }
 0x5cf   :  { %968 = vmatpush3.msra.mxu0 %v706_v29 }
 0x5d0   :  { %969 = vmatprep.subr.mxu0 %v705_v30 }
 0x5d1   :  { %970 = vmatpush3.msra.mxu0 %v705_v30 }
 0x5d2   :  { %971 = vmatprep.subr.mxu0 %v704_v31 }
 0x5d3   :  { %972 = vmatpush3.msra.mxu0 %v704_v31 }
 0x5d4   :  { %973 = vmatprep.subr.mxu0 %v703_v32 }
 0x5d5   :  { %974 = vmatpush3.msra.mxu0 %v703_v32 }
 0x5d6   :  { %975 = vmatprep.subr.mxu0 %v702_v33 }
 0x5d7   :  { %976 = vmatpush3.msra.mxu0 %v702_v33 }
 0x5d8   :  { %977 = vmatprep.subr.mxu0 %v701_v34 }
 0x5d9   :  { %978 = vmatpush3.msra.mxu0 %v701_v34 }
 0x5da   :  { %979 = vmatprep.subr.mxu0 %v700_v35 }
 0x5db   :  { %980 = vmatpush3.msra.mxu0 %v700_v35 }
 0x5dc   :  { %981 = vmatprep.subr.mxu0 %v699_v36 }
 0x5dd   :  { %982 = vmatpush3.msra.mxu0 %v699_v36 }
 0x5de   :  { %983 = vmatprep.subr.mxu0 %v698_v37 }
 0x5df   :  { %984 = vmatpush3.msra.mxu0 %v698_v37 }
 0x5e0   :  { %985 = vmatprep.subr.mxu0 %v697_v38 }
 0x5e1   :  { %986 = vmatpush3.msra.mxu0 %v697_v38 }
 0x5e2   :  { %987 = vmatprep.subr.mxu0 %v696_v39 }
 0x5e3   :  { %988 = vmatpush3.msra.mxu0 %v696_v39 }
 0x5e4   :  { %989 = vmatprep.subr.mxu0 %v695_v40 }
 0x5e5   :  { %990 = vmatpush3.msra.mxu0 %v695_v40 }
 0x5e6   :  { %991 = vmatprep.subr.mxu0 %v694_v41 }
 0x5e7   :  { %992 = vmatpush3.msra.mxu0 %v694_v41 }
 0x639   :  { %v1024_v48 = vpop.permute.xlu1 %1023 }
 0x63a   :  { %v1026_v51 = vunpack.i.h.bf16 %v1024_v48  ;;  %v1025_v52 = vunpack.i.l.bf16 %v1024_v48 }
 0x63c   :  { %v690_v58 = vsel %vm327_vm5, %v688_v57, %v1025_v52  ;;  %v691_v59 = vsel %vm327_vm5, %v689_v54, %v1026_v51 }
 0x687   :  { %v960_v42 = vpop.f32.mrf.mxu0 }
 0x688   :  { %v663_v44 = vsub.f32 %v960_v42, %v1230_v18 }
 0x689   :  { %v653_v43 = vpop.f32.mrf.mxu0 }
 0x68a   :  { %v662_v45 = vsub.f32 %v653_v43, %v1233_v19 }
 0x68c   :  { %v1027_v46 = vpack.i.bf16 %v663_v44, %v662_v45 }
 0x68e   :  { %1028 = vrot.lane.b32.xlu1 %v1027_v46, %s1062_s13 }
 0x700   :  { %v1029_v53 = vpop.permute.xlu1 %1028 }
 0x701   :  { %v1031_v55 = vunpack.i.h.bf16 %v1029_v53  ;;  %v1030_v56 = vunpack.i.l.bf16 %v1029_v53 }
 0x703   :  { %v692_v60 = vsel %vm330_vm6, %v690_v58, %v1030_v56  ;;  %v693_v61 = vsel %vm330_vm6, %v691_v59, %v1031_v55 }
 0x704   :  { %993 = vmatprep.mubr.f32.mxu0 %v692_v60 }
 0x705   :  { %994 = vmatmul.mubr.f32.vlgmr.msra.gmra.mxu0 %v693_v61 }
 0x7c5   :  { %v995_v63 = vpop.f32.mrf.mxu0 }
 0x7c6   :  { %v789_v0 = vadd.f32 %v995_v63, %v823_v62 }
 0x7c7   :  { %v783_v1 = vpop.f32.mrf.mxu0 }
 0x7c8   :  { %793 = vst.msk [vmem:[#allocation2 + $0x8] sm:$0xff] %vm324_vm4, %v789_v0  ;;  %v784_v2 = vadd.f32 %v823_v62, %v783_v1 }
 0x7ca   :  { %792 = vst.msk [vmem:[#allocation2] sm:$0xff] %vm324_vm4, %v784_v2 }
 0x7cb   :  { %1049 = shalt.err (!%p1046_p4)
}
 0x7cc   :  { %s1064_s20 = smov 128   ;;  %s1065_s5 = smov 8  }
 0x7cd   :  { %805 = dma.vmem_to_hbm [thread:$0]  %s800_s1, 256, %s1323_s6, [#allocation3], %s1064_s20, %s1064_s20, %s1065_s5  }
 0x7ce   :  { %1058 = dma.done.wait [#allocation3], 256  }
 0x7cf   :  { %1059 = vsyncadd [#allocation3], 4294967040 }
 0x7d0   :  { %809 = vsyncpa [#allocation3], 1 }

</bundles_post_ra>
